<compile_context>
chip_gen: v6e
topology: v6e:2x2x1
jax: 0.10.0
libtpu: 0.0.40
codegen_flags: <defaults>
</compile_context>

<pallas_src>
import functools

import jax
import jax.numpy as jnp
from jax.experimental import pallas as pl
from jax.experimental.pallas import tpu as pltpu

BN_EPS = 1e-5
NEG_SLOPE = 0.1  # nn.LeakyReLU(0.1) in the module


# --------------------------------------------------------------------------
# Pass 1: conv as one deep-K bf16 MXU matmul + per-tile BN partial stats.
# --------------------------------------------------------------------------
def conv_stats_kernel(ytop_ref, ybot_ref, w_ref, ypre_ref, stats_ref):
    # ytop/ybot blocks: (TH, Wo+1, 4*Cin) bf16     w: (16*Cin, Cout) bf16
    TH, Wp1, K4 = ytop_ref.shape
    Wo = Wp1 - 1

    # Merge the 4 remaining 2x2 taps into the contraction dim -> K = 16*Cin.
    slab = jnp.concatenate(
        [ytop_ref[:, :Wo, :], ytop_ref[:, 1:, :],
         ybot_ref[:, :Wo, :], ybot_ref[:, 1:, :]],
        axis=-1,
    ).reshape(TH * Wo, 4 * K4)                              # (TH*Wo, 16*Cin) bf16

    acc = jnp.dot(slab, w_ref[...], preferred_element_type=jnp.float32)

    # Pre-BN conv output stored bf16 (halves intermediate HBM traffic).
    ypre_ref[...] = acc.reshape(TH, Wo, -1).astype(ypre_ref.dtype)

    # Partial BatchNorm statistics from the f32 accumulator (exact; reduced
    # across tiles in the wrapper).
    s1 = jnp.sum(acc, axis=0, keepdims=True)                # (1, Cout)
    s2 = jnp.sum(acc * acc, axis=0, keepdims=True)          # (1, Cout)
    stats_ref[...] = jnp.concatenate([s1, s2], axis=0)[None]  # (1, 2, Cout)


# --------------------------------------------------------------------------
# Pass 2: affine BatchNorm (precomputed scale/shift) + LeakyReLU(0.1),
# operating on a lane-dense (rows, Wo*Cout) 2D view.
# --------------------------------------------------------------------------
def bn_lrelu_kernel(ypre_ref, scale_ref, shift_ref, out_ref):
    z = ypre_ref[...].astype(jnp.float32) * scale_ref[...] + shift_ref[...]
    out_ref[...] = jnp.where(z >= 0, z, NEG_SLOPE * z)


# --------------------------------------------------------------------------
# Parameter init (matches torch Conv2d / BatchNorm2d defaults) + MXU packing.
# --------------------------------------------------------------------------
def init_params(key, in_channels, out_channels):
    kw, kb = jax.random.split(key)
    fan_in = in_channels * 4 * 4
    bound = 1.0 / (fan_in ** 0.5)
    w = jax.random.uniform(kw, (out_channels, in_channels, 4, 4),
                           jnp.float32, -bound, bound)   # torch OIHW layout
    b = jax.random.uniform(kb, (out_channels,), jnp.float32, -bound, bound)

    # Pack for the kernel: ky=2a+dy, kx=2b+dx.  Slab K order is
    # (a, b, dy, dx, ci) which must match the space-to-depth channel order.
    w_r = w.reshape(out_channels, in_channels, 2, 2, 2, 2)   # (co, ci, a, dy, b, dx)
    w_p = jnp.transpose(w_r, (2, 4, 3, 5, 1, 0))             # (a, b, dy, dx, ci, co)
    w_big = w_p.reshape(16 * in_channels, out_channels).astype(jnp.bfloat16)

    return dict(
        w_raw=w, b=b, w_big=w_big,
        gamma=jnp.ones((out_channels,), jnp.float32),
        beta=jnp.zeros((out_channels,), jnp.float32),
    )


def _pick_block_h(Ho, Wo, Cin, Cout, budget_bytes=12 << 20):
    # Largest divisor of Ho whose per-step working set fits the VMEM budget
    # (2 bf16 halo views double-buffered + in-kernel slab/concat temporaries
    # + bf16 output double-buffered + f32 accumulator).
    per_row = (Wo + 1) * 4 * Cin * 2 * 2 * 2
    per_row += Wo * 16 * Cin * 2 * 2
    per_row += Wo * Cout * (2 * 2 + 4)
    cap = max(1, budget_bytes // max(per_row, 1))
    best = 1
    for d in range(1, Ho + 1):
        if Ho % d == 0 and d <= cap:
            best = d
    return best


def _pick_rows(R, C, budget_bytes=8 << 20):
    # Largest multiple-of-8 divisor of R under the VMEM budget (bf16 in + f32
    # out, both double-buffered); fall back to the full extent (always legal).
    per_row = C * (2 * 2 + 4 * 2)
    cap = max(8, budget_bytes // max(per_row, 1))
    best = None
    for d in range(8, R + 1, 8):
        if R % d == 0 and d <= cap:
            best = d
    return best if best is not None else R


# --------------------------------------------------------------------------
# Forward wrapper (NCHW in / NCHW out).
# --------------------------------------------------------------------------
@functools.partial(jax.jit, static_argnames=("block_h",))
def down_forward(params, x_nchw, block_h=None):
    N, Cin, H, W = x_nchw.shape
    assert H % 2 == 0 and W % 2 == 0, "spatial dims must be even"
    Cout = params["b"].shape[0]
    Ho, Wo = H // 2, W // 2

    # ---- layout glue: NCHW -> NHWC (bf16), pad=1, space-to-depth (factor 2) --
    # bf16 here is lossless w.r.t. the kernel (matmul operands are bf16 anyway)
    # and halves all glue + kernel-input HBM traffic.
    x = jnp.transpose(x_nchw, (0, 2, 3, 1)).astype(jnp.bfloat16)
    x_pad = jnp.pad(x, ((0, 0), (1, 1), (1, 1), (0, 0)))          # (N,H+2,W+2,Cin)
    y = x_pad.reshape(N, Ho + 1, 2, Wo + 1, 2, Cin)
    y = jnp.transpose(y, (0, 1, 3, 2, 4, 5)).reshape(N, Ho + 1, Wo + 1, 4 * Cin)
    # Row halo handled by two blocked views (a=0 and a=1 super-row taps).
    ytop = y[:, :Ho]                                              # (N,Ho,Wo+1,4Cin)
    ybot = y[:, 1:Ho + 1]

    if block_h is None:
        block_h = _pick_block_h(Ho, Wo, Cin, Cout)
    assert Ho % block_h == 0, "block_h must divide Ho"
    num_t = Ho // block_h

    in_spec_y = pl.BlockSpec((None, block_h, Wo + 1, 4 * Cin),
                             lambda n, t: (n, t, 0, 0))
    tile_spec = pl.BlockSpec((None, block_h, Wo, Cout),
                             lambda n, t: (n, t, 0, 0))

    # ---- pass 1: conv (deep-K matmul) + partial BN stats --------------------
    ypre, stats = pl.pallas_call(
        conv_stats_kernel,
        out_shape=(
            jax.ShapeDtypeStruct((N, Ho, Wo, Cout), jnp.bfloat16),
            jax.ShapeDtypeStruct((N * num_t, 2, Cout), jnp.float32),
        ),
        grid=(N, num_t),
        in_specs=[
            in_spec_y,
            in_spec_y,
            pl.BlockSpec((16 * Cin, Cout), lambda n, t: (0, 0)),
        ],
        out_specs=(
            tile_spec,
            pl.BlockSpec((1, 2, Cout), lambda n, t: (n * num_t + t, 0, 0)),
        ),
        compiler_params=pltpu.CompilerParams(
            dimension_semantics=("parallel", "parallel")),
    )(ytop, ybot, params["w_big"])

    # ---- finalize BN statistics (tiny glue reduction) ------------------------
    count = float(N * Ho * Wo)
    mean = jnp.sum(stats[:, 0, :], axis=0) / count
    var = jnp.maximum(jnp.sum(stats[:, 1, :], axis=0) / count - mean * mean, 0.0)
    inv = jax.lax.rsqrt(var + BN_EPS)
    scale = params["gamma"] * inv
    # Conv bias cancels exactly under training-mode BatchNorm (absorbed by the
    # batch mean), so it never enters the kernels.
    shift = params["beta"] - mean * scale

    # ---- pass 2: affine BN + LeakyReLU on a lane-dense 2D view ---------------
    R, C = N * Ho, Wo * Cout
    rows_pb = _pick_rows(R, C)
    scale_row = jnp.tile(scale, Wo).reshape(1, C)
    shift_row = jnp.tile(shift, Wo).reshape(1, C)

    out2d = pl.pallas_call(
        bn_lrelu_kernel,
        out_shape=jax.ShapeDtypeStruct((R, C), jnp.float32),
        grid=(R // rows_pb,),
        in_specs=[
            pl.BlockSpec((rows_pb, C), lambda r: (r, 0)),
            pl.BlockSpec((1, C), lambda r: (0, 0)),
            pl.BlockSpec((1, C), lambda r: (0, 0)),
        ],
        out_specs=pl.BlockSpec((rows_pb, C), lambda r: (r, 0)),
        compiler_params=pltpu.CompilerParams(
            dimension_semantics=("parallel",)),
    )(ypre.reshape(R, C), scale_row, shift_row)

    out = out2d.reshape(N, Ho, Wo, Cout)
    # back to NCHW (PyTorch convention)
    return jnp.transpose(out, (0, 3, 1, 2))


# --------------------------------------------------------------------------
# Pure-JAX reference (f32 everywhere; includes the bias, proving it cancels).
# --------------------------------------------------------------------------
def down_reference(params, x_nchw):
    y = jax.lax.conv_general_dilated(
        x_nchw.astype(jnp.float32), params["w_raw"],
        window_strides=(2, 2), padding=((1, 1), (1, 1)),
        dimension_numbers=("NCHW", "OIHW", "NCHW"))
    y = y + params["b"][None, :, None, None]
    mean = jnp.mean(y, axis=(0, 2, 3), keepdims=True)
    var = jnp.mean((y - mean) ** 2, axis=(0, 2, 3), keepdims=True)
    yn = (y - mean) * jax.lax.rsqrt(var + BN_EPS)
    yn = yn * params["gamma"][None, :, None, None] + params["beta"][None, :, None, None]
    return jnp.where(yn >= 0, yn, NEG_SLOPE * yn)


if __name__ == "__main__":
    key = jax.random.PRNGKey(0)
    k_p, k_x = jax.random.split(key)

    N, Cin, H, W = 2, 8, 16, 16
    Cout = 32

    params = init_params(k_p, Cin, Cout)
    x = jax.random.normal(k_x, (N, Cin, H, W), jnp.float32)   # NCHW

    out = down_forward(params, x, block_h=4)   # grid = (2 batches, 2 row-bands)
    out = jax.block_until_ready(out)
    assert out.shape == (N, Cout, H // 2, W // 2)

    # loose tolerance: kernel uses bf16 MXU operands and a bf16 intermediate
    # (f32 accumulation and f32 BN statistics)
    ref = down_reference(params, x)
    max_err = float(jnp.max(jnp.abs(out - ref)))
    assert max_err < 0.1, f"max abs error too large: {max_err}"

    print("KERNEL_OK")
</pallas_src>

<mosaic_0001>
module attributes {stable_mosaic.version = 11 : i64} {
  func.func @conv_stats_kernel(%arg0: i32, %arg1: i32, %arg2: memref<1x4x9x32xbf16, #tpu.memory_space<vmem>>, %arg3: memref<1x4x9x32xbf16, #tpu.memory_space<vmem>>, %arg4: memref<128x32xbf16, #tpu.memory_space<vmem>>, %arg5: memref<1x4x8x32xbf16, #tpu.memory_space<vmem>>, %arg6: memref<1x2x32xf32, #tpu.memory_space<vmem>>) attributes {dimension_semantics = [#tpu.dimension_semantics<parallel>, #tpu.dimension_semantics<parallel>], iteration_bounds = array<i64: 2, 2>, scalar_prefetch = 0 : i64, scratch_operands = 0 : i64, tpu.core_type = #tpu.core_type<tc>, window_params = [{transform_indices = @transform_0, window_bounds = array<i64: 1, 4, 9, 32>}, {transform_indices = @transform_1, window_bounds = array<i64: 1, 4, 9, 32>}, {pipeline_mode = #tpu.pipeline_mode<synchronous>, transform_indices = @transform_2, window_bounds = array<i64: 128, 32>}, {transform_indices = @transform_3, window_bounds = array<i64: 1, 4, 8, 32>}, {transform_indices = @transform_4, window_bounds = array<i64: 1, 2, 32>}]} {
    %c0 = arith.constant 0 : index
    %c0_0 = arith.constant 0 : index
    %c0_1 = arith.constant 0 : index
    %c0_2 = arith.constant 0 : index
    %0 = vector.load %arg2[%c0, %c0_0, %c0_1, %c0_2] : memref<1x4x9x32xbf16, #tpu.memory_space<vmem>>, vector<1x4x8x32xbf16>
    %1 = vector.shape_cast %0 : vector<1x4x8x32xbf16> to vector<4x8x32xbf16>
    %c0_3 = arith.constant 0 : index
    %c0_4 = arith.constant 0 : index
    %c1 = arith.constant 1 : index
    %c0_5 = arith.constant 0 : index
    %2 = vector.load %arg2[%c0_3, %c0_4, %c1, %c0_5] : memref<1x4x9x32xbf16, #tpu.memory_space<vmem>>, vector<1x4x8x32xbf16>
    %3 = vector.shape_cast %2 : vector<1x4x8x32xbf16> to vector<4x8x32xbf16>
    %c0_6 = arith.constant 0 : index
    %c0_7 = arith.constant 0 : index
    %c0_8 = arith.constant 0 : index
    %c0_9 = arith.constant 0 : index
    %4 = vector.load %arg3[%c0_6, %c0_7, %c0_8, %c0_9] : memref<1x4x9x32xbf16, #tpu.memory_space<vmem>>, vector<1x4x8x32xbf16>
    %5 = vector.shape_cast %4 : vector<1x4x8x32xbf16> to vector<4x8x32xbf16>
    %c0_10 = arith.constant 0 : index
    %c0_11 = arith.constant 0 : index
    %c1_12 = arith.constant 1 : index
    %c0_13 = arith.constant 0 : index
    %6 = vector.load %arg3[%c0_10, %c0_11, %c1_12, %c0_13] : memref<1x4x9x32xbf16, #tpu.memory_space<vmem>>, vector<1x4x8x32xbf16>
    %7 = vector.shape_cast %6 : vector<1x4x8x32xbf16> to vector<4x8x32xbf16>
    %8 = tpu.concatenate %1, %3, %5, %7 in 2 : vector<4x8x32xbf16>, vector<4x8x32xbf16>, vector<4x8x32xbf16>, vector<4x8x32xbf16> -> vector<4x8x128xbf16>
    %9 = vector.shape_cast %8 : vector<4x8x128xbf16> to vector<32x128xbf16>
    %c0_14 = arith.constant 0 : index
    %c0_15 = arith.constant 0 : index
    %10 = vector.load %arg4[%c0_14, %c0_15] : memref<128x32xbf16, #tpu.memory_space<vmem>>, vector<128x32xbf16>
    %cst = arith.constant dense<0.000000e+00> : vector<32x32xf32>
    %11 = tpu.matmul %9, %10, %cst {dimension_numbers = #tpu.dot_dimension_numbers<[1], [0], [0], [1], [0, 0, 1, 1], [], []>} : vector<32x128xbf16>, vector<128x32xbf16>, vector<32x32xf32> -> vector<32x32xf32>
    %12 = vector.shape_cast %11 : vector<32x32xf32> to vector<4x8x32xf32>
    %13 = arith.truncf %12 : vector<4x8x32xf32> to vector<4x8x32xbf16>
    %c0_16 = arith.constant 0 : index
    %c0_17 = arith.constant 0 : index
    %c0_18 = arith.constant 0 : index
    %c0_19 = arith.constant 0 : index
    %14 = vector.load %arg5[%c0_16, %c0_17, %c0_18, %c0_19] : memref<1x4x8x32xbf16, #tpu.memory_space<vmem>>, vector<1x4x8x32xbf16>
    %15 = vector.shape_cast %14 : vector<1x4x8x32xbf16> to vector<4x8x32xbf16>
    %16 = vector.shape_cast %13 : vector<4x8x32xbf16> to vector<1x4x8x32xbf16>
    tpu.vector_store %arg5[%c0_16, %c0_17, %c0_18, %c0_19], %16 {strides = array<i32>} : memref<1x4x8x32xbf16, #tpu.memory_space<vmem>>, vector<1x4x8x32xbf16>,
    %cst_20 = arith.constant dense<0.000000e+00> : vector<32xf32>
    %17 = vector.multi_reduction <add>, %11, %cst_20 [0] : vector<32x32xf32> to vector<32xf32>
    %18 = vector.shape_cast %17 : vector<32xf32> to vector<1x32xf32>
    %19 = arith.mulf %11, %11 : vector<32x32xf32>
    %cst_21 = arith.constant dense<0.000000e+00> : vector<32xf32>
    %20 = vector.multi_reduction <add>, %19, %cst_21 [0] : vector<32x32xf32> to vector<32xf32>
    %21 = vector.shape_cast %20 : vector<32xf32> to vector<1x32xf32>
    %22 = tpu.concatenate %18, %21 in 0 : vector<1x32xf32>, vector<1x32xf32> -> vector<2x32xf32>
    %23 = vector.shape_cast %22 : vector<2x32xf32> to vector<1x2x32xf32>
    %c0_22 = arith.constant 0 : index
    %c0_23 = arith.constant 0 : index
    %c0_24 = arith.constant 0 : index
    %24 = vector.load %arg6[%c0_22, %c0_23, %c0_24] : memref<1x2x32xf32, #tpu.memory_space<vmem>>, vector<1x2x32xf32>
    tpu.vector_store %arg6[%c0_22, %c0_23, %c0_24], %23 {strides = array<i32>} : memref<1x2x32xf32, #tpu.memory_space<vmem>>, vector<1x2x32xf32>,
    return
  }
  func.func @transform_0(%arg0: i32, %arg1: i32) -> (i32, i32, i32, i32) {
    %c0_i32 = arith.constant 0 : i32
    %c0_i32_0 = arith.constant 0 : i32
    %c0_i32_1 = arith.constant 0 : i32
    return %arg0, %arg1, %c0_i32, %c0_i32_0 : i32, i32, i32, i32
  }
  func.func @transform_1(%arg0: i32, %arg1: i32) -> (i32, i32, i32, i32) {
    %c0_i32 = arith.constant 0 : i32
    %c0_i32_0 = arith.constant 0 : i32
    %c0_i32_1 = arith.constant 0 : i32
    return %arg0, %arg1, %c0_i32, %c0_i32_0 : i32, i32, i32, i32
  }
  func.func @transform_2(%arg0: i32, %arg1: i32) -> (i32, i32) {
    %c0_i32 = arith.constant 0 : i32
    %c0_i32_0 = arith.constant 0 : i32
    %c0_i32_1 = arith.constant 0 : i32
    return %c0_i32, %c0_i32_0 : i32, i32
  }
  func.func @transform_3(%arg0: i32, %arg1: i32) -> (i32, i32, i32, i32) {
    %c0_i32 = arith.constant 0 : i32
    %c0_i32_0 = arith.constant 0 : i32
    %c0_i32_1 = arith.constant 0 : i32
    return %arg0, %arg1, %c0_i32, %c0_i32_0 : i32, i32, i32, i32
  }
  func.func @transform_4(%arg0: i32, %arg1: i32) -> (i32, i32, i32) {
    %c2_i32 = arith.constant 2 : i32
    %0 = arith.muli %arg0, %c2_i32 : i32
    %1 = arith.addi %0, %arg1 : i32
    %c0_i32 = arith.constant 0 : i32
    %c0_i32_0 = arith.constant 0 : i32
    %c0_i32_1 = arith.constant 0 : i32
    return %1, %c0_i32, %c0_i32_0 : i32, i32, i32
  }
}

module attributes {stable_mosaic.version = 11 : i64} {
  func.func @bn_lrelu_kernel(%arg0: i32, %arg1: memref<16x256xbf16, #tpu.memory_space<vmem>>, %arg2: memref<1x256xf32, #tpu.memory_space<vmem>>, %arg3: memref<1x256xf32, #tpu.memory_space<vmem>>, %arg4: memref<16x256xf32, #tpu.memory_space<vmem>>) attributes {dimension_semantics = [#tpu.dimension_semantics<parallel>], iteration_bounds = array<i64: 1>, scalar_prefetch = 0 : i64, scratch_operands = 0 : i64, tpu.core_type = #tpu.core_type<tc>, window_params = [{transform_indices = @transform_0, window_bounds = array<i64: 16, 256>}, {pipeline_mode = #tpu.pipeline_mode<synchronous>, transform_indices = @transform_1, window_bounds = array<i64: 1, 256>}, {pipeline_mode = #tpu.pipeline_mode<synchronous>, transform_indices = @transform_2, window_bounds = array<i64: 1, 256>}, {transform_indices = @transform_3, window_bounds = array<i64: 16, 256>}]} {
    %c0 = arith.constant 0 : index
    %c0_0 = arith.constant 0 : index
    %0 = vector.load %arg1[%c0, %c0_0] : memref<16x256xbf16, #tpu.memory_space<vmem>>, vector<16x256xbf16>
    %1 = arith.extf %0 : vector<16x256xbf16> to vector<16x256xf32>
    %c0_1 = arith.constant 0 : index
    %c0_2 = arith.constant 0 : index
    %2 = vector.load %arg2[%c0_1, %c0_2] : memref<1x256xf32, #tpu.memory_space<vmem>>, vector<1x256xf32>
    %3 = vector.broadcast %2 : vector<1x256xf32> to vector<16x256xf32>
    %4 = arith.mulf %1, %3 : vector<16x256xf32>
    %c0_3 = arith.constant 0 : index
    %c0_4 = arith.constant 0 : index
    %5 = vector.load %arg3[%c0_3, %c0_4] : memref<1x256xf32, #tpu.memory_space<vmem>>, vector<1x256xf32>
    %6 = vector.broadcast %5 : vector<1x256xf32> to vector<16x256xf32>
    %7 = arith.addf %4, %6 : vector<16x256xf32>
    %cst = arith.constant 0.000000e+00 : f32
    %8 = vector.broadcast %cst : f32 to vector<16x256xf32>
    %9 = arith.cmpf oge, %7, %8 : vector<16x256xf32>
    %cst_5 = arith.constant 1.000000e-01 : f32
    %10 = vector.broadcast %cst_5 : f32 to vector<16x256xf32>
    %11 = arith.mulf %10, %7 : vector<16x256xf32>
    %12 = arith.select %9, %7, %11 : vector<16x256xi1>, vector<16x256xf32>
    %c0_6 = arith.constant 0 : index
    %c0_7 = arith.constant 0 : index
    %13 = vector.load %arg4[%c0_6, %c0_7] : memref<16x256xf32, #tpu.memory_space<vmem>>, vector<16x256xf32>
    tpu.vector_store %arg4[%c0_6, %c0_7], %12 {strides = array<i32>} : memref<16x256xf32, #tpu.memory_space<vmem>>, vector<16x256xf32>,
    return
  }
  func.func @transform_0(%arg0: i32) -> (i32, i32) {
    %c0_i32 = arith.constant 0 : i32
    %c0_i32_0 = arith.constant 0 : i32
    return %arg0, %c0_i32 : i32, i32
  }
  func.func @transform_1(%arg0: i32) -> (i32, i32) {
    %c0_i32 = arith.constant 0 : i32
    %c0_i32_0 = arith.constant 0 : i32
    %c0_i32_1 = arith.constant 0 : i32
    return %c0_i32, %c0_i32_0 : i32, i32
  }
  func.func @transform_2(%arg0: i32) -> (i32, i32) {
    %c0_i32 = arith.constant 0 : i32
    %c0_i32_0 = arith.constant 0 : i32
    %c0_i32_1 = arith.constant 0 : i32
    return %c0_i32, %c0_i32_0 : i32, i32
  }
  func.func @transform_3(%arg0: i32) -> (i32, i32) {
    %c0_i32 = arith.constant 0 : i32
    %c0_i32_0 = arith.constant 0 : i32
    return %arg0, %c0_i32 : i32, i32
  }
}

</mosaic_0001>

<bundles_post_ra>
// kernel: tile.13
= control target key start
LH: loop header
LB: loop body
LE: loop exit
PB: predicated region body
PF: predicated region fallthrough
CT: control target
= control target key end

     0   :  { %s22_s0 = inlined_call_operand.vmem [shape: f32[32], index: 0, kind: input, shape index: {}]   ;;  %s23_s1 = inlined_call_operand.vmem [shape: f32[8,32], index: 1, kind: output, shape index: {}]  }
   0x1   :  { %v4_v0 = vld [vmem:[%s22_s0] ss:$0 sm:$0xff] }
   0x2   :  { %5 = vst [vmem:[%s23_s1] sm:$0xff] %v4_v0 }

// kernel: tile.14
= control target key start
LH: loop header
LB: loop body
LE: loop exit
PB: predicated region body
PF: predicated region fallthrough
CT: control target
= control target key end

     0   :  { %s7_s6 = smov 3  ;;  %s14_s9 = smov 3  ;;  %vm4_vm0 = vcmask 261120   ;;  %vm11_vm1 = vcmask 1048320   ;;  %vm18_vm2 = vcmask 785920   ;;  %vm25_vm3 = vcmask 523520   ;;  %s79_s0 = inlined_call_operand.vmem [shape: f32[8,32], index: 0, kind: input, shape index: {}]   ;;  %s80_s1 = inlined_call_operand.vmem [shape: f32[1,256], index: 1, kind: output, shape index: {}]  }
   0x1   :  { %v41_v0 = vld [vmem:[%s79_s0 + $0x3] ss:$4 sm:%s7_s6]   ;;  %s48_s10 = smov 96   ;;  %s21_s11 = smov 3  ;;  %v42_v1 = vld [vmem:[%s79_s0 + $0x2] ss:$4 sm:%s14_s9]  }
   0x2   :  { %9 = vrot.lane.b32.xlu0 %v41_v0, %s48_s10  ;;  %v43_v2 = vld [vmem:[%s79_s0 + $0x1] ss:$4 sm:%s21_s11]   ;;  %s2_s16 = smov 3  ;;  %s49_s17 = smov 32  }
   0x3   :  { %23 = vrot.lane.b32.xlu1 %v43_v2, %s49_s17  ;;  %v3_v3 = vld [vmem:[%s79_s0] ss:$4 sm:%s2_s16]   ;;  %s50_s0 = smov 64  }
   0x4   :  { %5 = vst.msk [vmem:[#allocation0] ss:$8 sm:$0x3] %vm4_vm0, %v3_v3  }
   0x6   :  { %16 = vrot.lane.b32.xlu0 %v42_v1, %s50_s0 }
  0x74   :  { %v10_v4 = vpop.permute.xlu0 %9  }
  0x75   :  { %12 = vst.msk [vmem:[#allocation0] ss:$8 sm:$0x3] %vm11_vm1, %v10_v4   ;;  %v24_v5 = vpop.permute.xlu1 %23  }
  0x78   :  { %v17_v6 = vpop.permute.xlu0 %16  }
  0x79   :  { %19 = vst.msk [vmem:[#allocation0] ss:$8 sm:$0x3] %vm18_vm2, %v17_v6  }
  0x7a   :  { %26 = vst.msk [vmem:[#allocation0] ss:$8 sm:$0x3] %vm25_vm3, %v24_v5  }
  0x81   :  { %v31_v7 = vld [vmem:[#allocation0] sm:$0x1]  ;;  %v36_v8 = vld [vmem:[#allocation0 + $0x8] sm:$0x1] }
  0x82   :  { %34 = vst [vmem:[%s80_s1] sm:$0x1] %v31_v7  ;;  %44 = vst [vmem:[%s80_s1 + $0x1] sm:$0x1] %v36_v8 }

// kernel: down_forward.3
= control target key start
LH: loop header
LB: loop body
LE: loop exit
PB: predicated region body
PF: predicated region fallthrough
CT: control target
= control target key end

     0   :  { %v22_v0 = vlaneseq  ;;  %s116_s0 = inlined_call_operand.vmem [shape: bf16[16,256], index: 0, kind: input, shape index: {}]   ;;  %s117_s1 = inlined_call_operand.vmem [shape: f32[1,256], index: 1, kind: input, shape index: {}]   ;;  %s118_s2 = inlined_call_operand.vmem [shape: f32[1,256], index: 2, kind: input, shape index: {}]   ;;  %s119_s3 = inlined_call_operand.vmem [shape: f32[16,256], index: 3, kind: output, shape index: {}]  }
   0x1   :  { %v14_v1 = vld [vmem:[%s116_s0] sm:$0xff]  ;;  %v15_v3 = vld [vmem:[%s116_s0 + $0x8] sm:$0xff] }
   0x2   :  { %v23_v2 = vshrl.u32 %v22_v0, 7  ;;  %v16_v4 = vunpack.c.l.bf16 %v14_v1  ;;  %v20_v5 = vld [vmem:[%s117_s1] sm:$0x3]  ;;  %v17_v7 = vunpack.c.h.bf16 %v14_v1  ;;  %v18_v10 = vunpack.c.l.bf16 %v15_v3 }
   0x3   :  { %v36_v6 = vld [vmem:[%s118_s2] sm:$0x3]  ;;  %v19_v11 = vunpack.c.h.bf16 %v15_v3 }
   0x4   :  { %v24_v8 = vsub.s32 0, %v23_v2  ;;  %v28_v9 = vsub.s32 1, %v23_v2 }
   0x6   :  { %v25_v12 = vrot.slane %v20_v5, %v24_v8  ;;  %v41_v13 = vrot.slane %v36_v6, %v24_v8  ;;  %v29_v14 = vrot.slane %v20_v5, %v28_v9  ;;  %v45_v15 = vrot.slane %v36_v6, %v28_v9 }
   0x8   :  { %v32_v16 = vmul.f32 %v25_v12, %v16_v4  ;;  %v33_v17 = vmul.f32 %v29_v14, %v17_v7  ;;  %v34_v18 = vmul.f32 %v25_v12, %v18_v10  ;;  %v35_v19 = vmul.f32 %v29_v14, %v19_v11 }
   0xa   :  { %v48_v20 = vadd.f32 %v41_v13, %v32_v16  ;;  %v49_v21 = vadd.f32 %v45_v15, %v33_v17  ;;  %v50_v22 = vadd.f32 %v41_v13, %v34_v18  ;;  %v51_v23 = vadd.f32 %v45_v15, %v35_v19 }
   0xc   :  { %vm52_vm0 = vcmp.ge.f32.partialorder %v48_v20, 0.0  ;;  %v56_v24 = vmul.f32 0.1, %v48_v20  ;;  %vm53_vm1 = vcmp.ge.f32.partialorder %v49_v21, 0.0  ;;  %v57_v25 = vmul.f32 0.1, %v49_v21 }
   0xd   :  { %vm54_vm2 = vcmp.ge.f32.partialorder %v50_v22, 0.0  ;;  %v58_v26 = vmul.f32 0.1, %v50_v22  ;;  %vm55_vm3 = vcmp.ge.f32.partialorder %v51_v23, 0.0  ;;  %v59_v27 = vmul.f32 0.1, %v51_v23 }
   0xe   :  { %v60_v28 = vsel %vm52_vm0, %v48_v20, %v56_v24  ;;  %v61_v29 = vsel %vm53_vm1, %v49_v21, %v57_v25 }
   0xf   :  { %64 = vst [vmem:[%s119_s3] sm:$0xff] %v60_v28  ;;  %65 = vst [vmem:[%s119_s3 + $0x8] sm:$0xff] %v61_v29  ;;  %v62_v30 = vsel %vm54_vm2, %v50_v22, %v58_v26  ;;  %v63_v31 = vsel %vm55_vm3, %v51_v23, %v59_v27 }
  0x10   :  { %66 = vst [vmem:[%s119_s3 + $0x10] sm:$0xff] %v62_v30  ;;  %67 = vst [vmem:[%s119_s3 + $0x18] sm:$0xff] %v63_v31 }

// kernel: down_forward.2
= control target key start
LH: loop header
LB: loop body
LE: loop exit
PB: predicated region body
PF: predicated region fallthrough
CT: control target
= control target key end

     0   :  { %s996_s15 = smov 0   ;;  %s998_s16 = smov 0   ;;  %s1143_s0 = inlined_call_operand.vmem [shape: bf16[2,8,9,32], index: 0, kind: input, shape index: {}]   ;;  %s1144_s1 = inlined_call_operand.vmem [shape: bf16[2,8,9,32], index: 1, kind: input, shape index: {}]   ;;  %s1145_s2 = inlined_call_operand.vmem [shape: bf16[128,32], index: 2, kind: input, shape index: {}]   ;;  %s1146_s3 = inlined_call_operand.vmem [shape: bf16[2,8,8,32], index: 3, kind: output, shape index: {0}]   ;;  %s1147_s4 = inlined_call_operand.vmem [shape: f32[4,2,32], index: 4, kind: output, shape index: {1}]  }
   0x1   :  { %s1000_s17 = smov 0   ;;  %s1002_s18 = smov 0  }
   0x2   :  { %s1004_s19 = smov 0  }
   0x3 LB: > { %s24_s20 = sadd.s32 1, %s958_s17  ;;  %s27_s21 = sadd.s32 1, %s962_s18  ;;  %s966_s19 = sphi %s1004_s19, %s15_s19   ;;  %s962_s18 = sphi %s1002_s18, %s1151_s18   ;;  %s958_s17 = sphi %s1000_s17, %s1150_s17   ;;  %s954_s16 = sphi %s998_s16, %s1149_s16   ;;  %s950_s15 = sphi %s996_s15, %s1148_s15  }
   0x4   : > { %p25_p0 = scmp.ge.s32.totalorder %s24_s20, 2  ;;  %p797_p1 = scmp.ge.s32.totalorder %s966_s19, 1 }
   0x5   : > { %p209_p2 = scmp.lt.s32.totalorder %s966_s19, 5 }
   0x6   : > { %s1153_s20 = smov (%p25_p0, %s24_s20), 0  ;;  %s1155_s21 = smov (!%p25_p0, %s27_s21), %s962_s18 }
   0x7   : > { %p210_p3 = pnand %p797_p1, %p209_p2  ;;  %p29_p4 = scmp.ge.s32.totalorder %s1155_s21, 2 }
   0x8   : > { %s798_s22 = sshll.u32 (!%p210_p3), %s950_s15, 2  ;;  %p261_p5 = scmp.lt.s32.totalorder (!%p210_p3), %s954_s16, 1 }
   0x9   : > { %s1157_s21 = smov (%p29_p4, %s1155_s21), 0  ;;  %213 = sbr.rel (%p210_p3) target bundleno = 385 (0x181), region = 32 }
   0xa   : > { %p263_p6 = scmp.lt.s32.totalorder (!%p210_p3), %s798_s22, 7  ;;  %s968_s24 = smov (!%p210_p3), 64  }
   0xb   : > { %s969_s30 = smov (!%p210_p3), 32   ;;  %s970_s11 = smov (!%p210_p3), 96  }
   0xc   : > { %s809_s14 = sshll.u32 (!%p210_p3), %s954_s16, 1 }
   0xd   : > { %s293_s23 = sadd.s32 (!%p210_p3), %s950_s15, %s809_s14 }
   0xe   : > { %v920_v0 = vld [vmem:[%s1145_s2 + $0x38] sm:$0xff]   ;;  %v921_v1 = vld [vmem:[%s1145_s2 + $0x30] sm:$0xff]   ;;  %s1039_s27 = scalar_select %p261_p5, %s954_s16, 1  ;;  %v922_v2 = vld [vmem:[%s1145_s2 + $0x28] sm:$0xff]   ;;  %vm441_vm0 = vcmask 261120   ;;  %vm454_vm1 = vcmask 523264  }
   0xf   : > { %s1159_s22 = smov (!%p263_p6, %s798_s22), 7  ;;  %845 = vmatprep.subr.bf16.mxu0 %v920_v0  ;;  %v923_v10 = vld [vmem:[%s1145_s2 + $0x20] sm:$0xff]   ;;  %v924_v19 = vld [vmem:[%s1145_s2 + $0x18] sm:$0xff]   ;;  %v925_v45 = vld [vmem:[%s1145_s2 + $0x10] sm:$0xff]   ;;  %vm463_vm2 = vcmask 785408   ;;  %vm601_vm3 = vcmask 257024  }
  0x10   : > { %s800_s28 = sshll.u32 %s1039_s27, 4  ;;  %846 = vmatpush3.bf16.msra.mxu0 %v920_v0  ;;  %s799_s29 = sshll.u32 %s1159_s22, 1  ;;  %v926_v58 = vld [vmem:[%s1145_s2 + $0x8] sm:$0xff]   ;;  %vm636_vm4 = vcmask 1040384   ;;  %vm638_vm5 = vcmask 254976  }
  0x11   : > { %847 = vmatprep.subr.bf16.mxu0 %v921_v1  ;;  %s267_s6 = sadd.s32 %s800_s28, %s799_s29  ;;  %p294_p7 = scmp.lt.s32.totalorder %s293_s23, 3 }
  0x12   : > { %s801_s7 = sshll.u32 %s267_s6, 2 }
  0x13   : > { %s280_s10 = scalar_lea.vmem %s1144_s1, %s801_s7  ;;  %s1054_s13 = scalar_lea.vmem %s1143_s0, %s801_s7 }
  0x14   : > { %848 = vmatpush3.bf16.msra.mxu0 %v921_v1  ;;  %v310_v3 = vld [vmem:[%s280_s10 + $0x8] sm:$0xf]  ;;  %v314_v4 = vld [vmem:[%s280_s10 + $0xc] sm:$0x1]  ;;  %v309_v5 = vld [vmem:[%s280_s10] sm:$0xf] }
  0x15   : > { %849 = vmatprep.subr.bf16.mxu0 %v922_v2  ;;  %v816_v6 = vcombine.low %v310_v3, %v310_v3  ;;  %v313_v7 = vld [vmem:[%s280_s10 + $0x4] sm:$0x1]  ;;  %v815_v8 = vcombine.low %v309_v5, %v309_v5  ;;  %v312_v9 = vld [vmem:[%s280_s10 + $0x18] sm:$0xf]  ;;  %v316_v11 = vld [vmem:[%s280_s10 + $0x1c] sm:$0x1]  ;;  %v820_v14 = vcombine.low %v310_v3, %v314_v4 }
  0x16   : > { %v311_v12 = vld [vmem:[%s280_s10 + $0x10] sm:$0xf]  ;;  %v818_v15 = vcombine.low %v312_v9, %v312_v9  ;;  %v307_v17 = vld [vmem:[%s1054_s13 + $0x14] sm:$0x1]  ;;  %v1064_v18 = vld [vmem:[%s1054_s13] sm:$0xf]  ;;  %v819_v24 = vcombine.low %v309_v5, %v313_v7  ;;  %v822_v34 = vcombine.low %v312_v9, %v316_v11 }
  0x17   : > { %v1060_v13 = vld [vmem:[%s1054_s13 + $0x10] sm:$0xf]  ;;  %387 = vrot.lane.b32.xlu1 %v816_v6, %s968_s24  ;;  %385 = vrot.lane.b32.xlu0 %v815_v8, %s968_s24  ;;  %v817_v16 = vcombine.low %v311_v12, %v311_v12  ;;  %v315_v20 = vld [vmem:[%s280_s10 + $0x14] sm:$0x1]  ;;  %v415_v33 = vshll.u32 %v820_v14, 16  ;;  %v413_v50 = vshrl.u32 %v820_v14, 16 }
  0x18   : > { %v813_v21 = vcombine.low %v1060_v13, %v307_v17  ;;  %v305_v22 = vld [vmem:[%s1054_s13 + $0x4] sm:$0x1]  ;;  %v1072_v23 = vld [vmem:[%s1054_s13 + $0x18] sm:$0xf]  ;;  %850 = vmatpush3.bf16.msra.mxu0 %v922_v2  ;;  %v308_v26 = vld [vmem:[%s1054_s13 + $0x1c] sm:$0x1]  ;;  %v821_v37 = vcombine.low %v311_v12, %v315_v20 }
  0x19   : > { %v811_v25 = vcombine.low %v1064_v18, %v305_v22  ;;  %v1077_v27 = vld [vmem:[%s1054_s13 + $0x8] sm:$0xf]  ;;  %v306_v28 = vld [vmem:[%s1054_s13 + $0xc] sm:$0x1]  ;;  %851 = vmatprep.subr.bf16.mxu0 %v923_v10  ;;  %v814_v31 = vcombine.low %v1072_v23, %v308_v26  ;;  %v408_v41 = vshll.u32 %v819_v24, 16  ;;  %v417_v52 = vrot.slane %v415_v33, 1 }
  0x1a   : > { %v352_v29 = vshrl.u32 %v813_v21, 16  ;;  %v354_v30 = vshll.u32 %v813_v21, 16  ;;  %v812_v32 = vcombine.low %v1077_v27, %v306_v28  ;;  %v429_v53 = vshll.u32 %v822_v34, 16  ;;  %s807_s7 = sshll.u32 %s1039_s27, 3  ;;  %v927_v1 = vld [vmem:[%s1145_s2] sm:$0xff]   ;;  %s1161_s23 = smov (!%p294_p7, %s293_s23), 3 }
  0x1b   : > { %391 = vrot.lane.b32.xlu1 %v818_v15, %s968_s24  ;;  %389 = vrot.lane.b32.xlu0 %v817_v16, %s968_s24  ;;  %v338_v35 = vshrl.u32 %v811_v25, 16  ;;  %v340_v36 = vshll.u32 %v811_v25, 16  ;;  %v359_v39 = vshrl.u32 %v814_v31, 16  ;;  %v361_v40 = vshll.u32 %v814_v31, 16  ;;  %s1090_s8 = sadd.s32 %s807_s7, %s1159_s22  ;;  %s810_s16 = sshll.u32 %s1161_s23, 1 }
  0x1c   : > { %v356_v38 = vrot.slane %v354_v30, 1  ;;  %852 = vmatpush3.bf16.msra.mxu0 %v923_v10  ;;  %v345_v43 = vshrl.u32 %v812_v32, 16  ;;  %v347_v44 = vshll.u32 %v812_v32, 16  ;;  %v406_v54 = vshrl.u32 %v819_v24, 16  ;;  %s808_s22 = sshll.u32 %s1090_s8, 2  ;;  %s297_s25 = scalar_lea.vmem %s1147_s4, %s810_s16 }
  0x1d   : > { %v342_v42 = vrot.slane %v340_v36, 1  ;;  %853 = vmatprep.subr.bf16.mxu0 %v924_v19  ;;  %v363_v47 = vrot.slane %v361_v40, 1  ;;  %v410_v56 = vrot.slane %v408_v41, 1  ;;  %v422_v57 = vshll.u32 %v821_v37, 16  ;;  %s290_s13 = scalar_lea.vmem %s1146_s3, %s808_s22 }
  0x1e   : > { %v357_v46 = vor.u32 %v356_v38, %v352_v29  ;;  %v349_v49 = vrot.slane %v347_v44, 1  ;;  %v418_v59 = vor.u32 %v417_v52, %v413_v50  ;;  %v427_v60 = vshrl.u32 %v822_v34, 16 }
  0x1f   : > { %v343_v48 = vor.u32 %v342_v42, %v338_v35  ;;  %v364_v51 = vor.u32 %v363_v47, %v359_v39  ;;  %v431_v61 = vrot.slane %v429_v53, 1  ;;  %v411_v62 = vor.u32 %v410_v56, %v406_v54 }
  0x20   : > { %369 = vrot.lane.b32.xlu1 %v357_v46, %s969_s30  ;;  %854 = vmatpush3.bf16.msra.mxu0 %v924_v19  ;;  %v350_v55 = vor.u32 %v349_v49, %v345_v43  ;;  %v420_v63 = vshrl.u32 %v821_v37, 16  ;;  %v424_v0 = vrot.slane %v422_v57, 1 }
  0x21   : > { %365 = vrot.lane.b32.xlu0 %v343_v48, %s969_s30  ;;  %855 = vmatprep.subr.bf16.mxu0 %v925_v45  ;;  %v432_v2 = vor.u32 %v431_v61, %v427_v60 }
  0x22   : > { %v425_v3 = vor.u32 %v424_v0, %v420_v63 }
  0x24   : > { %371 = vrot.lane.b32.xlu1 %v364_v51, %s969_s30  ;;  %856 = vmatpush3.bf16.msra.mxu0 %v925_v45 }
  0x25   : > { %367 = vrot.lane.b32.xlu0 %v350_v55, %s969_s30  ;;  %857 = vmatprep.subr.bf16.mxu0 %v926_v58 }
  0x28   : > { %435 = vrot.lane.b32.xlu1 %v418_v59, %s970_s11  ;;  %858 = vmatpush3.bf16.msra.mxu0 %v926_v58 }
  0x29   : > { %433 = vrot.lane.b32.xlu0 %v411_v62, %s970_s11  ;;  %859 = vmatprep.subr.bf16.mxu0 %v927_v1 }
  0x2c   : > { %439 = vrot.lane.b32.xlu1 %v432_v2, %s970_s11  ;;  %860 = vmatpush3.bf16.msra.mxu0 %v927_v1 }
  0x2d   : > { %437 = vrot.lane.b32.xlu0 %v425_v3, %s970_s11 }
  0x89   : > { %v388_v4 = vpop.permute.xlu1 %387  ;;  %v386_v5 = vpop.permute.xlu0 %385 }
  0x8d   : > { %v392_v6 = vpop.permute.xlu1 %391  ;;  %v390_v7 = vpop.permute.xlu0 %389 }
  0x92   : > { %v370_v8 = vpop.permute.xlu1 %369 }
  0x93   : > { %v366_v9 = vpop.permute.xlu0 %365  ;;  %v450_v22 = vsel %vm441_vm0, %v1060_v13, %v370_v8 }
  0x94   : > { %v444_v12 = vsel %vm441_vm0, %v1064_v18, %v366_v9  ;;  %v460_v28 = vsel %vm454_vm1, %v450_v22, %v390_v7 }
  0x95   : > { %v456_v20 = vsel %vm454_vm1, %v444_v12, %v386_v5 }
  0x96   : > { %v372_v10 = vpop.permute.xlu1 %371 }
  0x97   : > { %v368_v11 = vpop.permute.xlu0 %367  ;;  %v453_v17 = vsel %vm441_vm0, %v1072_v23, %v372_v10 }
  0x98   : > { %v447_v14 = vsel %vm441_vm0, %v1077_v27, %v368_v11  ;;  %v462_v25 = vsel %vm454_vm1, %v453_v17, %v392_v6 }
  0x99   : > { %v458_v16 = vsel %vm454_vm1, %v447_v14, %v388_v4 }
  0x9a   : > { %v436_v15 = vpop.permute.xlu1 %435 }
  0x9b   : > { %v434_v19 = vpop.permute.xlu0 %433  ;;  %v467_v21 = vsel %vm463_vm2, %v458_v16, %v436_v15 }
  0x9c   : > { %v465_v18 = vsel %vm463_vm2, %v456_v20, %v434_v19 }
  0x9d   : > { %v823_v24 = vcombine.low %v465_v18, %v467_v21 }
  0x9e   : > { %v440_v26 = vpop.permute.xlu1 %439 }
  0x9f   : > { %v471_v27 = vsel %vm463_vm2, %v462_v25, %v440_v26  ;;  %861 = vmatprep.mubr.bf16.mxu0 %v823_v24  ;;  %v438_v29 = vpop.permute.xlu0 %437 }
  0xa0   : > { %v469_v23 = vsel %vm463_vm2, %v460_v28, %v438_v29 }
  0xa1   : > { %v824_v30 = vcombine.low %v469_v23, %v471_v27 }
  0xa3   : > { %862 = vmatmul.mubr.bf16.vlgmr.msra.gmra.mxu0 %v824_v30 }
 0x163   : > { %v863_v13 = vpop.f32.mrf.mxu0 }
 0x164   : > { %v599_v31 = vpack.c.bf16 %v863_v13, %v863_v13  ;;  %v621_v37 = vmul.f32 %v863_v13, %v863_v13  ;;  %v609_v44 = vsel %vm441_vm0, %v863_v13, 0.0 }
 0x165   : > { %v582_v32 = vpop.f32.mrf.mxu0 }
 0x166   : > { %604 = vst.msk [vmem:[%s290_s13 + $0x8] sm:$0xf] %vm601_vm3, %v599_v31  ;;  %v597_v33 = vpack.c.bf16 %v582_v32, %v582_v32  ;;  %v619_v35 = vmul.f32 %v582_v32, %v582_v32  ;;  %v606_v39 = vsel %vm441_vm0, %v582_v32, 0.0  ;;  %v626_v50 = vsel %vm441_vm0, %v621_v37, 0.0 }
 0x167   : > { %v864_v34 = vpop.f32.mrf.mxu0 }
 0x168   : > { %602 = vst.msk [vmem:[%s290_s13] sm:$0xf] %vm601_vm3, %v597_v33  ;;  %v600_v36 = vpack.c.bf16 %v864_v34, %v864_v34  ;;  %v623_v45 = vsel %vm441_vm0, %v619_v35, 0.0  ;;  %v622_v46 = vmul.f32 %v864_v34, %v864_v34  ;;  %v611_v51 = vsel %vm441_vm0, %v864_v34, 0.0 }
 0x169   : > { %v585_v38 = vpop.f32.mrf.mxu0 }
 0x16a   : > { %605 = vst.msk [vmem:[%s290_s13 + $0xc] sm:$0xf] %vm601_vm3, %v600_v36  ;;  %v598_v40 = vpack.c.bf16 %v585_v38, %v585_v38  ;;  %v607_v41 = vsel %vm441_vm0, %v585_v38, 0.0  ;;  %v620_v42 = vmul.f32 %v585_v38, %v585_v38  ;;  %v628_v54 = vsel %vm441_vm0, %v622_v46, 0.0 }
 0x16b   : > { %v608_v43 = vadd.f32 %v607_v41, %v606_v39 }
 0x16c   : > { %603 = vst.msk [vmem:[%s290_s13 + $0x4] sm:$0xf] %vm601_vm3, %v598_v40  ;;  %v624_v47 = vsel %vm441_vm0, %v620_v42, 0.0 }
 0x16d   : > { %v610_v48 = vadd.f32 %v609_v44, %v608_v43  ;;  %v625_v49 = vadd.f32 %v624_v47, %v623_v45 }
 0x16f   : > { %v612_v52 = vadd.f32 %v611_v51, %v610_v48  ;;  %v627_v53 = vadd.f32 %v626_v50, %v625_v49 }
 0x171   : > { %v613_v55 = vrot.slane %v612_v52, 4  ;;  %v629_v56 = vadd.f32 %v628_v54, %v627_v53 }
 0x173   : > { %v614_v57 = vadd.f32 %v613_v55, %v612_v52  ;;  %v630_v58 = vrot.slane %v629_v56, 4 }
 0x175   : > { %v615_v59 = vrot.slane %v614_v57, 2  ;;  %v631_v60 = vadd.f32 %v630_v58, %v629_v56 }
 0x177   : > { %v616_v61 = vadd.f32 %v615_v59, %v614_v57  ;;  %v632_v62 = vrot.slane %v631_v60, 2 }
 0x179   : > { %v617_v63 = vrot.slane %v616_v61, 1  ;;  %v633_v0 = vadd.f32 %v632_v62, %v631_v60 }
 0x17b   : > { %v634_v1 = vrot.slane %v633_v0, 1  ;;  %v618_v2 = vadd.f32 %v617_v63, %v616_v61 }
 0x17d   : > { %v635_v3 = vadd.f32 %v634_v1, %v633_v0 }
 0x17f   : > { %v637_v4 = vsel %vm636_vm4, %v618_v2, %v635_v3 }
 0x180   : > { %639 = vst.msk [vmem:[%s297_s25] sm:$0x3] %vm638_vm5, %v637_v4 }
 0x181 PF: > { %s15_s19 = sadd.s32 1, %s966_s19   ;;  %s1148_s15 = smov %s958_s17 }
 0x182   : > { %p12_p8 = scmp.ge.s32.totalorder %s15_s19, 6   ;;  %s1149_s16 = smov %s962_s18 }
 0x183   : > { %s1150_s17 = smov %s1153_s20  ;;  %s1151_s18 = smov %s1157_s21 }
 0x184   :  { %14 = sbr.rel (!%p12_p8) target bundleno = 3 (0x3), region = 77 }

</bundles_post_ra>
